<compile_context>
chip_gen: v5e
topology: v5e:2x2
jax: 0.10.0
libtpu: 0.0.40
codegen_flags: <defaults>
</compile_context>

<pallas_src>
import functools

import jax
import jax.numpy as jnp
from jax.experimental import pallas as pl
from jax.experimental.pallas import tpu as pltpu


def _local_attention_kernel(q_ref, *refs, span, look_backward, causal,
                            num_windows, scale):
    """One (batch element, query window) tile of local attention.

    q_ref            : (1, w, e)          queries of this window (input dtype)
    refs[:span]      : span x (1, w, e)   keys of windows n-lb .. n+lf (index clamped)
    refs[span:2span] : span x (1, w, e)   values of the same windows
    refs[2*span]     : (1, w, e)          output window
    """
    k_refs = refs[:span]
    v_refs = refs[span:2 * span]
    o_ref = refs[2 * span]

    w = q_ref.shape[1]
    e = q_ref.shape[2]
    n = pl.program_id(1)                                    # query window index
    mask_value = -jnp.finfo(jnp.float32).max

    # Fold the softmax scale into q: touches (w, e) elements instead of (w, span*w).
    q = q_ref[0] * scale                                    # stays in the input dtype

    # Causal mask is only needed on the diagonal offset (off == look_backward):
    # earlier offsets are fully visible, later offsets cannot exist when causal.
    if causal:
        i_idx = jax.lax.broadcasted_iota(jnp.int32, (w, w), 0)
        j_idx = jax.lax.broadcasted_iota(jnp.int32, (w, w), 1)
        tri = i_idx >= j_idx

    # Per-offset QK^T blocks (MXU: input dtype operands, f32 accumulation).
    s_blocks = []
    for off in range(span):                                 # span is 2-3: Python unroll
        k_off = k_refs[off][0]                              # (w, e)
        s = jnp.einsum('ie,je->ij', q, k_off,
                       preferred_element_type=jnp.float32)  # (w, w) f32
        if causal and off == look_backward:
            s = jnp.where(tri, s, mask_value)
        kwin = n + (off - look_backward)                    # unpadded key-window index
        in_range = jnp.logical_and(kwin >= 0, kwin < num_windows)
        s = jnp.where(in_range, s, mask_value)              # scalar predicate broadcast
        s_blocks.append(s)

    # Softmax over the whole look-around span; statistics kept in f32.
    m = s_blocks[0].max(axis=-1, keepdims=True)
    for s in s_blocks[1:]:
        m = jnp.maximum(m, s.max(axis=-1, keepdims=True))

    l = jnp.zeros((w, 1), jnp.float32)
    acc = jnp.zeros((w, e), jnp.float32)
    for off in range(span):
        p = jnp.exp(s_blocks[off] - m)                      # masked columns -> exactly 0
        l = l + p.sum(axis=-1, keepdims=True)
        acc = acc + jnp.einsum('ij,je->ie',
                               p.astype(v_refs[off].dtype), v_refs[off][0],
                               preferred_element_type=jnp.float32)

    acc = acc * pl.reciprocal(l, approx=True)               # flash-style finalize
    o_ref[...] = acc[None].astype(o_ref.dtype)


def local_attention(q, k, v, *, window_size, causal=False,
                    look_backward=1, look_forward=None):
    """Forward pass of LocalAttention.

    TODO(synk): shared_qk (k-normalisation + TOKEN_SELF_ATTN_VALUE diagonal),
    rel_pos embedding, input_mask, train-mode dropout and autopad are not implemented.
    """
    look_forward = (0 if causal else 1) if look_forward is None else look_forward
    assert not (causal and look_forward > 0), 'you cannot look forward if causal'

    orig_shape = q.shape
    merge = lambda x: x.reshape(-1, x.shape[-2], x.shape[-1])
    q, k, v = map(merge, (q, k, v))
    b, t, e = q.shape
    w = window_size
    assert t % w == 0, f'sequence length {t} must be divisible by window size {w}'
    assert w % 8 == 0, 'window_size must be a multiple of 8 for TPU sublane tiling'
    nw = t // w
    lb, lf = look_backward, look_forward
    span = lb + 1 + lf

    kernel = functools.partial(
        _local_attention_kernel, span=span, look_backward=lb, causal=causal,
        num_windows=nw, scale=e ** -0.5)

    # One query window per grid step.  The K/V look-around is expressed as `span`
    # shifted window BlockSpecs whose window index is clamped into range; the
    # out-of-range windows are masked inside the kernel, so K/V need no padding pass.
    q_spec = pl.BlockSpec((1, w, e), lambda bi, ni: (bi, ni, 0))

    def kv_spec(off):
        shift = off - lb
        return pl.BlockSpec(
            (1, w, e),
            lambda bi, ni, _s=shift: (bi, jnp.clip(ni + _s, 0, nw - 1), 0))

    kv_specs = [kv_spec(off) for off in range(span)]

    itemsize = jnp.dtype(q.dtype).itemsize
    cost = pl.CostEstimate(
        flops=4 * b * t * span * w * e,                     # QK^T + PV
        transcendentals=b * t * span * w,                   # exp
        bytes_accessed=(2 * b * t * e                       # q + o
                        + 2 * span * b * t * e) * itemsize)  # k + v incl. halo refetch

    out = pl.pallas_call(
        kernel,
        out_shape=jax.ShapeDtypeStruct((b, t, e), q.dtype),
        grid=(b, nw),
        in_specs=[q_spec] + kv_specs + kv_specs,
        out_specs=pl.BlockSpec((1, w, e), lambda bi, ni: (bi, ni, 0)),
        compiler_params=pltpu.CompilerParams(
            dimension_semantics=("parallel", "parallel")),
        cost_estimate=cost,
    )(q, *([k] * span), *([v] * span))

    return out.reshape(orig_shape)


def _local_attention_reference(q, k, v, *, window_size, causal=False,
                               look_backward=1, look_forward=None):
    """Pure-JAX port of the PyTorch forward (used only for verification)."""
    look_forward = (0 if causal else 1) if look_forward is None else look_forward
    orig_shape = q.shape
    merge = lambda x: x.reshape(-1, x.shape[-2], x.shape[-1])
    q, k, v = map(merge, (q, k, v))
    b, t, e = q.shape
    w = window_size
    nw = t // w
    hp = jax.lax.Precision.HIGHEST

    bucket = lambda x: x.reshape(b, nw, w, -1)
    bq, bk, bv = map(bucket, (q, k, v))
    ticker = jnp.arange(t, dtype=jnp.float32).reshape(1, nw, w)

    def look_around(x, pad_value):
        pad_width = [(0, 0)] * x.ndim
        pad_width[1] = (look_backward, look_forward)
        px = jnp.pad(x, pad_width, constant_values=pad_value)
        parts = [px[:, ind:ind + nw] for ind in range(look_forward + look_backward + 1)]
        return jnp.concatenate(parts, axis=2)

    bkk = look_around(bk, -1.0)
    bvv = look_around(bv, -1.0)
    bq_t = ticker
    bq_k = look_around(ticker, -1.0)

    dots = jnp.einsum('bnie,bnje->bnij', bq, bkk, precision=hp) * (e ** -0.5)
    mask_value = -jnp.finfo(dots.dtype).max
    if causal:
        dots = jnp.where(bq_t[:, :, :, None] < bq_k[:, :, None, :], mask_value, dots)
    dots = jnp.where(bq_k[:, :, None, :] == -1, mask_value, dots)
    attn = jax.nn.softmax(dots, axis=-1)
    out = jnp.einsum('bnij,bnje->bnie', attn, bvv, precision=hp)
    return out.reshape(orig_shape)


if __name__ == "__main__":
    key = jax.random.PRNGKey(0)
    kq, kk, kv = jax.random.split(key, 3)

    # (batch=2, heads=4, seq=64, dim_head=32), window_size=16 -> 4 windows of 16.
    batch, heads, seq, dim_head = 2, 4, 64, 32
    window_size = 16
    q = jax.random.normal(kq, (batch, heads, seq, dim_head), dtype=jnp.float32)
    k = jax.random.normal(kk, (batch, heads, seq, dim_head), dtype=jnp.float32)
    v = jax.random.normal(kv, (batch, heads, seq, dim_head), dtype=jnp.float32)

    configs = [
        dict(window_size=window_size, causal=True, look_backward=1, look_forward=None),
        dict(window_size=window_size, causal=False, look_backward=1, look_forward=None),
        dict(window_size=window_size, causal=True, look_backward=2, look_forward=None),
    ]
    for cfg in configs:
        out = local_attention(q, k, v, **cfg)
        out = jax.block_until_ready(out)
        ref = _local_attention_reference(q, k, v, **cfg)
        assert out.shape == q.shape, out.shape
        assert out.dtype == q.dtype, out.dtype
        max_err = jnp.max(jnp.abs(out - ref))
        assert jnp.allclose(out, ref, atol=5e-3, rtol=5e-3), (
            f"mismatch for config {cfg}: max abs err {max_err:.3e}")

    print("KERNEL_OK")
</pallas_src>

<mosaic_0001>
module attributes {stable_mosaic.version = 11 : i64} {
  func.func @_local_attention_kernel(%arg0: i32, %arg1: i32, %arg2: memref<1x16x32xf32, #tpu.memory_space<vmem>>, %arg3: memref<1x16x32xf32, #tpu.memory_space<vmem>>, %arg4: memref<1x16x32xf32, #tpu.memory_space<vmem>>, %arg5: memref<1x16x32xf32, #tpu.memory_space<vmem>>, %arg6: memref<1x16x32xf32, #tpu.memory_space<vmem>>, %arg7: memref<1x16x32xf32, #tpu.memory_space<vmem>>) attributes {dimension_semantics = [#tpu.dimension_semantics<parallel>, #tpu.dimension_semantics<parallel>], iteration_bounds = array<i64: 8, 4>, scalar_prefetch = 0 : i64, scratch_operands = 0 : i64, tpu.core_type = #tpu.core_type<tc>, window_params = [{transform_indices = @transform_0, window_bounds = array<i64: 1, 16, 32>}, {transform_indices = @transform_1, window_bounds = array<i64: 1, 16, 32>}, {transform_indices = @transform_2, window_bounds = array<i64: 1, 16, 32>}, {transform_indices = @transform_3, window_bounds = array<i64: 1, 16, 32>}, {transform_indices = @transform_4, window_bounds = array<i64: 1, 16, 32>}, {transform_indices = @transform_5, window_bounds = array<i64: 1, 16, 32>}]} {
    %c0 = arith.constant 0 : index
    %c0_0 = arith.constant 0 : index
    %c0_1 = arith.constant 0 : index
    %0 = vector.load %arg2[%c0, %c0_0, %c0_1] : memref<1x16x32xf32, #tpu.memory_space<vmem>>, vector<1x16x32xf32>
    %1 = vector.shape_cast %0 : vector<1x16x32xf32> to vector<16x32xf32>
    %cst = arith.constant 0.176776692 : f32
    %2 = vector.broadcast %cst : f32 to vector<16x32xf32>
    %3 = arith.mulf %1, %2 : vector<16x32xf32>
    %4 = tpu.iota {dimensions = array<i32: 0>} : vector<16x16xi32>
    %5 = tpu.iota {dimensions = array<i32: 1>} : vector<16x16xi32>
    %6 = arith.cmpi sge, %4, %5 : vector<16x16xi32>
    %c0_2 = arith.constant 0 : index
    %c0_3 = arith.constant 0 : index
    %c0_4 = arith.constant 0 : index
    %7 = vector.load %arg3[%c0_2, %c0_3, %c0_4] : memref<1x16x32xf32, #tpu.memory_space<vmem>>, vector<1x16x32xf32>
    %8 = vector.shape_cast %7 : vector<1x16x32xf32> to vector<16x32xf32>
    "tpu.trace_start"() <{level = 10 : i32, message = "ie,je->ij"}> : () -> ()
    %cst_5 = arith.constant dense<0.000000e+00> : vector<16x16xf32>
    %9 = tpu.matmul %3, %8, %cst_5 {dimension_numbers = #tpu.dot_dimension_numbers<[1], [1], [0], [0], [0, 0, 1, 0], [], []>} : vector<16x32xf32>, vector<16x32xf32>, vector<16x16xf32> -> vector<16x16xf32>
    "tpu.trace_stop"() : () -> ()
    %c-1_i32 = arith.constant -1 : i32
    %10 = arith.addi %arg1, %c-1_i32 : i32
    %c0_i32 = arith.constant 0 : i32
    %11 = arith.cmpi sge, %10, %c0_i32 : i32
    %c4_i32 = arith.constant 4 : i32
    %12 = arith.cmpi slt, %10, %c4_i32 : i32
    %13 = arith.andi %11, %12 : i1
    %cst_6 = arith.constant -3.40282347E+38 : f32
    %14 = vector.broadcast %cst_6 : f32 to vector<16x16xf32>
    %15 = arith.select %13, %9, %14 : vector<16x16xf32>
    %c0_7 = arith.constant 0 : index
    %c0_8 = arith.constant 0 : index
    %c0_9 = arith.constant 0 : index
    %16 = vector.load %arg4[%c0_7, %c0_8, %c0_9] : memref<1x16x32xf32, #tpu.memory_space<vmem>>, vector<1x16x32xf32>
    %17 = vector.shape_cast %16 : vector<1x16x32xf32> to vector<16x32xf32>
    "tpu.trace_start"() <{level = 10 : i32, message = "ie,je->ij"}> : () -> ()
    %cst_10 = arith.constant dense<0.000000e+00> : vector<16x16xf32>
    %18 = tpu.matmul %3, %17, %cst_10 {dimension_numbers = #tpu.dot_dimension_numbers<[1], [1], [0], [0], [0, 0, 1, 0], [], []>} : vector<16x32xf32>, vector<16x32xf32>, vector<16x16xf32> -> vector<16x16xf32>
    %cst_11 = arith.constant -3.40282347E+38 : f32
    "tpu.trace_stop"() : () -> ()
    %19 = vector.broadcast %cst_11 : f32 to vector<16x16xf32>
    %20 = arith.select %6, %18, %19 : vector<16x16xi1>, vector<16x16xf32>
    %c0_i32_12 = arith.constant 0 : i32
    %21 = arith.addi %arg1, %c0_i32_12 : i32
    %c0_i32_13 = arith.constant 0 : i32
    %22 = arith.cmpi sge, %21, %c0_i32_13 : i32
    %c4_i32_14 = arith.constant 4 : i32
    %23 = arith.cmpi slt, %21, %c4_i32_14 : i32
    %24 = arith.andi %22, %23 : i1
    %cst_15 = arith.constant -3.40282347E+38 : f32
    %25 = vector.broadcast %cst_15 : f32 to vector<16x16xf32>
    %26 = arith.select %24, %20, %25 : vector<16x16xf32>
    %cst_16 = arith.constant dense<0xFF800000> : vector<16xf32>
    %27 = vector.multi_reduction <maximumf>, %15, %cst_16 [1] : vector<16x16xf32> to vector<16xf32>
    %28 = vector.shape_cast %27 : vector<16xf32> to vector<16x1xf32>
    %cst_17 = arith.constant dense<0xFF800000> : vector<16xf32>
    %29 = vector.multi_reduction <maximumf>, %26, %cst_17 [1] : vector<16x16xf32> to vector<16xf32>
    %30 = vector.shape_cast %29 : vector<16xf32> to vector<16x1xf32>
    %31 = arith.maximumf %28, %30 : vector<16x1xf32>
    %cst_18 = arith.constant 0.000000e+00 : f32
    %32 = vector.broadcast %cst_18 : f32 to vector<16x1xf32>
    %cst_19 = arith.constant 0.000000e+00 : f32
    %33 = vector.broadcast %cst_19 : f32 to vector<16x32xf32>
    %34 = vector.broadcast %31 : vector<16x1xf32> to vector<16x16xf32>
    %35 = arith.subf %15, %34 : vector<16x16xf32>
    %36 = math.exp %35 : vector<16x16xf32>
    %cst_20 = arith.constant dense<0.000000e+00> : vector<16xf32>
    %37 = vector.multi_reduction <add>, %36, %cst_20 [1] : vector<16x16xf32> to vector<16xf32>
    %38 = vector.shape_cast %37 : vector<16xf32> to vector<16x1xf32>
    %39 = arith.addf %32, %38 : vector<16x1xf32>
    %c0_21 = arith.constant 0 : index
    %c0_22 = arith.constant 0 : index
    %c0_23 = arith.constant 0 : index
    %40 = vector.load %arg5[%c0_21, %c0_22, %c0_23] : memref<1x16x32xf32, #tpu.memory_space<vmem>>, vector<1x16x32xf32>
    %41 = vector.shape_cast %40 : vector<1x16x32xf32> to vector<16x32xf32>
    "tpu.trace_start"() <{level = 10 : i32, message = "ij,je->ie"}> : () -> ()
    %cst_24 = arith.constant dense<0.000000e+00> : vector<16x32xf32>
    %42 = tpu.matmul %36, %41, %cst_24 {dimension_numbers = #tpu.dot_dimension_numbers<[1], [0], [0], [1], [0, 0, 1, 1], [], []>} : vector<16x16xf32>, vector<16x32xf32>, vector<16x32xf32> -> vector<16x32xf32>
    "tpu.trace_stop"() : () -> ()
    %43 = arith.addf %33, %42 : vector<16x32xf32>
    %44 = vector.broadcast %31 : vector<16x1xf32> to vector<16x16xf32>
    %45 = arith.subf %26, %44 : vector<16x16xf32>
    %46 = math.exp %45 : vector<16x16xf32>
    %cst_25 = arith.constant dense<0.000000e+00> : vector<16xf32>
    %47 = vector.multi_reduction <add>, %46, %cst_25 [1] : vector<16x16xf32> to vector<16xf32>
    %48 = vector.shape_cast %47 : vector<16xf32> to vector<16x1xf32>
    %49 = arith.addf %39, %48 : vector<16x1xf32>
    %c0_26 = arith.constant 0 : index
    %c0_27 = arith.constant 0 : index
    %c0_28 = arith.constant 0 : index
    %50 = vector.load %arg6[%c0_26, %c0_27, %c0_28] : memref<1x16x32xf32, #tpu.memory_space<vmem>>, vector<1x16x32xf32>
    %51 = vector.shape_cast %50 : vector<1x16x32xf32> to vector<16x32xf32>
    "tpu.trace_start"() <{level = 10 : i32, message = "ij,je->ie"}> : () -> ()
    %cst_29 = arith.constant dense<0.000000e+00> : vector<16x32xf32>
    %52 = tpu.matmul %46, %51, %cst_29 {dimension_numbers = #tpu.dot_dimension_numbers<[1], [0], [0], [1], [0, 0, 1, 1], [], []>} : vector<16x16xf32>, vector<16x32xf32>, vector<16x32xf32> -> vector<16x32xf32>
    "tpu.trace_stop"() : () -> ()
    %53 = arith.addf %43, %52 : vector<16x32xf32>
    %54 = tpu.reciprocal %49 {approx = true} : vector<16x1xf32> -> vector<16x1xf32>
    %55 = vector.broadcast %54 : vector<16x1xf32> to vector<16x32xf32>
    %56 = arith.mulf %53, %55 : vector<16x32xf32>
    %57 = vector.shape_cast %56 : vector<16x32xf32> to vector<1x16x32xf32>
    %c0_30 = arith.constant 0 : index
    %c0_31 = arith.constant 0 : index
    %c0_32 = arith.constant 0 : index
    %58 = vector.load %arg7[%c0_30, %c0_31, %c0_32] : memref<1x16x32xf32, #tpu.memory_space<vmem>>, vector<1x16x32xf32>
    tpu.vector_store %arg7[%c0_30, %c0_31, %c0_32], %57 {strides = array<i32>} : memref<1x16x32xf32, #tpu.memory_space<vmem>>, vector<1x16x32xf32>,
    return
  }
  func.func @transform_0(%arg0: i32, %arg1: i32) -> (i32, i32, i32) {
    %c0_i32 = arith.constant 0 : i32
    %c0_i32_0 = arith.constant 0 : i32
    return %arg0, %arg1, %c0_i32 : i32, i32, i32
  }
  func.func @transform_1(%arg0: i32, %arg1: i32) -> (i32, i32, i32) {
    %c-1_i32 = arith.constant -1 : i32
    %0 = arith.addi %arg1, %c-1_i32 : i32
    %c0_i32 = arith.constant 0 : i32
    %c3_i32 = arith.constant 3 : i32
    %1 = arith.maxsi %c0_i32, %0 : i32
    %2 = arith.minsi %c3_i32, %1 : i32
    %c0_i32_0 = arith.constant 0 : i32
    %c0_i32_1 = arith.constant 0 : i32
    return %arg0, %2, %c0_i32_0 : i32, i32, i32
  }
  func.func @transform_2(%arg0: i32, %arg1: i32) -> (i32, i32, i32) {
    %c0_i32 = arith.constant 0 : i32
    %0 = arith.addi %arg1, %c0_i32 : i32
    %c0_i32_0 = arith.constant 0 : i32
    %c3_i32 = arith.constant 3 : i32
    %1 = arith.maxsi %c0_i32_0, %0 : i32
    %2 = arith.minsi %c3_i32, %1 : i32
    %c0_i32_1 = arith.constant 0 : i32
    %c0_i32_2 = arith.constant 0 : i32
    return %arg0, %2, %c0_i32_1 : i32, i32, i32
  }
  func.func @transform_3(%arg0: i32, %arg1: i32) -> (i32, i32, i32) {
    %c-1_i32 = arith.constant -1 : i32
    %0 = arith.addi %arg1, %c-1_i32 : i32
    %c0_i32 = arith.constant 0 : i32
    %c3_i32 = arith.constant 3 : i32
    %1 = arith.maxsi %c0_i32, %0 : i32
    %2 = arith.minsi %c3_i32, %1 : i32
    %c0_i32_0 = arith.constant 0 : i32
    %c0_i32_1 = arith.constant 0 : i32
    return %arg0, %2, %c0_i32_0 : i32, i32, i32
  }
  func.func @transform_4(%arg0: i32, %arg1: i32) -> (i32, i32, i32) {
    %c0_i32 = arith.constant 0 : i32
    %0 = arith.addi %arg1, %c0_i32 : i32
    %c0_i32_0 = arith.constant 0 : i32
    %c3_i32 = arith.constant 3 : i32
    %1 = arith.maxsi %c0_i32_0, %0 : i32
    %2 = arith.minsi %c3_i32, %1 : i32
    %c0_i32_1 = arith.constant 0 : i32
    %c0_i32_2 = arith.constant 0 : i32
    return %arg0, %2, %c0_i32_1 : i32, i32, i32
  }
  func.func @transform_5(%arg0: i32, %arg1: i32) -> (i32, i32, i32) {
    %c0_i32 = arith.constant 0 : i32
    %c0_i32_0 = arith.constant 0 : i32
    return %arg0, %arg1, %c0_i32 : i32, i32, i32
  }
}

</mosaic_0001>

<bundles_post_ra>
// kernel: tpu_custom_call.1
= control target key start
LH: loop header
LB: loop body
LE: loop exit
PB: predicated region body
PF: predicated region fallthrough
CT: control target
= control target key end

     0   :  { %s1153_s18 = smov 0   ;;  %s1155_s19 = smov 0   ;;  %s1266_s0 = inlined_call_operand.vmem [shape: f32[8,64,32], index: 0, kind: input, shape index: {}]   ;;  %s1267_s1 = inlined_call_operand.vmem [shape: f32[8,64,32], index: 1, kind: input, shape index: {}]   ;;  %s1268_s2 = inlined_call_operand.vmem [shape: f32[8,64,32], index: 2, kind: input, shape index: {}]   ;;  %s1269_s3 = inlined_call_operand.vmem [shape: f32[8,64,32], index: 3, kind: input, shape index: {}]   ;;  %s1270_s4 = inlined_call_operand.vmem [shape: f32[8,64,32], index: 4, kind: input, shape index: {}]   ;;  %s1271_s5 = inlined_call_operand.vmem [shape: f32[8,64,32], index: 5, kind: output, shape index: {}]  }
   0x1   :  { %s1157_s20 = smov 0   ;;  %s1159_s21 = smov 0  }
   0x2   :  { %s1161_s22 = smov 0  }
   0x3 LB: > { %s24_s23 = sadd.s32 1, %s1113_s20  ;;  %s27_s24 = sadd.s32 1, %s1117_s21  ;;  %s1121_s22 = sphi %s1161_s22, %s15_s22   ;;  %s1117_s21 = sphi %s1159_s21, %s1275_s21   ;;  %s1113_s20 = sphi %s1157_s20, %s1274_s20   ;;  %s1109_s19 = sphi %s1155_s19, %s1273_s19   ;;  %s1105_s18 = sphi %s1153_s18, %s1272_s18  }
   0x4   : > { %p25_p0 = scmp.ge.s32.totalorder %s24_s23, 4  ;;  %p952_p1 = scmp.ge.s32.totalorder %s1121_s22, 1 }
   0x5   : > { %p348_p2 = scmp.lt.s32.totalorder %s1121_s22, 33 }
   0x6   : > { %s1277_s23 = smov (%p25_p0, %s24_s23), 0  ;;  %s1279_s24 = smov (!%p25_p0, %s27_s24), %s1117_s21 }
   0x7   : > { %p349_p3 = pnand %p952_p1, %p348_p2  ;;  %p29_p4 = scmp.ge.s32.totalorder %s1279_s24, 8 }
   0x8   : > { %p439_p5 = scmp.lt.s32.totalorder (!%p349_p3), %s1109_s19, 7  ;;  %s1186_s25 = sadd.s32 (!%p349_p3), 4294967295, %s1105_s18 }
   0x9   : > { %s1281_s24 = smov (%p29_p4, %s1279_s24), 0  ;;  %352 = sbr.rel (%p349_p3) target bundleno = 444 (0x1bc), region = 40 }
   0xa   : > { %p449_p6 = scmp.gt.s32.totalorder (!%p349_p3), %s1186_s25, 0  ;;  %p956_p7 = scmp.lt.s32.totalorder (!%p349_p3), %s1186_s25, 3 }
   0xb   : > { %s953_s27 = sshll.u32 (!%p349_p3), %s1105_s18, 1  ;;  %p468_p10 = scmp.gt.s32.totalorder (!%p349_p3), %s1105_s18, 0 }
   0xc   : > { %p441_p8 = scmp.lt.s32.totalorder (!%p349_p3), %s953_s27, 7  ;;  %p964_p11 = scmp.lt.s32.totalorder (!%p349_p3), %s1105_s18, 3 }
   0xd   : > { %p584_p13 = scmp.ge.s32.totalorder (!%p349_p3), %s1186_s25, 0  ;;  %p585_p0 = scmp.lt.s32.totalorder (!%p349_p3), %s1186_s25, 4 }
   0xe   : > { %s1283_s19 = smov (!%p439_p5, %s1109_s19), 7  ;;  %s1287_s27 = smov (!%p441_p8, %s953_s27), 7  ;;  %vm547_vm0 = vcmask 261120   ;;  %vm635_vm2 = vcmask 130048   ;;  %v538_v12 = vlaneseq }
   0xf   : > { %s450_s26 = scalar_select %p449_p6, %s1186_s25, 0 }
  0x10   : > { %s954_s28 = sshll.u32 %s1283_s19, 3  ;;  %p586_p1 = pnand %p585_p0, %p584_p13  ;;  %v539_v13 = vshrl.u32 %v538_v12, 7  ;;  %v542_v14 = vand.u32 127, %v538_v12 }
  0x11   : > { %s1285_s26 = smov (!%p956_p7, %s450_s26), 3  ;;  %s444_s30 = sadd.s32 %s954_s28, %s1287_s27 }
  0x12   : > { %s961_s29 = sshll.u32 %s1285_s26, 1  ;;  %s1194_s7 = sshll.u32 %s444_s30, 3  ;;  %vm543_vm3 = vcmp.ge.s32.totalorder %v539_v13, %v542_v14  ;;  %v540_v22 = vadd.s32 8, %v539_v13 }
  0x13   : > { %p456_p9 = scmp.lt.s32.totalorder %s961_s29, 7  ;;  %s446_s11 = scalar_lea.vmem %s1266_s0, %s1194_s7 }
  0x14   : > { %s469_s15 = scalar_select %p468_p10, %s1105_s18, 0  ;;  %v534_v1 = vld [vmem:[%s446_s11] sm:$0xff]  ;;  %v535_v4 = vld [vmem:[%s446_s11 + $0x8] sm:$0xff]  ;;  %vm544_vm5 = vcmp.ge.s32.totalorder %v540_v22, %v542_v14 }
  0x15   : > { %s1289_s29 = smov (!%p456_p9, %s961_s29), 7  ;;  %v536_v3 = vmul.f32 0.17677669, %v534_v1  ;;  %v537_v6 = vmul.f32 0.17677669, %v535_v4  ;;  %p626_p2 = scmp.ge.s32.totalorder %s1105_s18, 0 }
  0x16   : > { %s459_s6 = sadd.s32 %s954_s28, %s1289_s29  ;;  %s1291_s15 = smov (!%p964_p11, %s469_s15), 3 }
  0x17   : > { %s1196_s8 = sshll.u32 %s459_s6, 3  ;;  %s969_s16 = sshll.u32 %s1291_s15, 1 }
  0x18   : > { %s461_s14 = scalar_lea.vmem %s1267_s1, %s1196_s8  ;;  %p475_p12 = scmp.lt.s32.totalorder %s969_s16, 7 }
  0x19   : > { %v546_v0 = vld [vmem:[%s461_s14 + $0x8] sm:$0xff]  ;;  %v545_v2 = vld [vmem:[%s461_s14] sm:$0xff]  ;;  %p627_p3 = scmp.lt.s32.totalorder %s1105_s18, 4  ;;  %s499_s11 = scalar_lea.vmem %s1269_s3, %s1196_s8 }
  0x1a   : > { %991 = vmatpush.xpose.msk.msra.mxu0 %vm547_vm0, %v546_v0  ;;  %s1293_s16 = smov (!%p475_p12, %s969_s16), 7  ;;  %v665_v29 = vld [vmem:[%s499_s11 + $0x8] sm:$0xff]  ;;  %v664_v31 = vld [vmem:[%s499_s11] sm:$0xff]  ;;  %s532_s13 = scalar_lea.vmem %s1271_s5, %s1194_s7 }
  0x1b   : > { %s478_s17 = sadd.s32 %s954_s28, %s1293_s16  ;;  %p628_p4 = pnand %p627_p3, %p626_p2  ;;  %731 = vmatpush.msra.mxu3 %v665_v29 }
  0x1c   : > { %s1210_s19 = sshll.u32 %s478_s17, 3 }
  0x1d   : > { %s480_s29 = scalar_lea.vmem %s1268_s2, %s1210_s19  ;;  %s518_s6 = scalar_lea.vmem %s1270_s4, %s1210_s19  ;;  %732 = vmatpush.msra.mxu3 %v664_v31 }
  0x1e   : > { %992 = vmatpush.xpose.msk.msra.mxu0 %vm547_vm0, %v545_v2  ;;  %v594_v5 = vld [vmem:[%s480_s29 + $0x8] sm:$0xff]  ;;  %v593_v7 = vld [vmem:[%s480_s29] sm:$0xff]  ;;  %s995_s28 = scalar_select %p586_p1, 0, 1 }
  0x1f   : > { %996 = vmatpush.xpose.msk.msra.mxu1 %vm547_vm0, %v594_v5  ;;  %s1000_s30 = scalar_select %p628_p4, 0, 1  ;;  %v681_v28 = vld [vmem:[%s518_s6 + $0x8] sm:$0xff]  ;;  %v680_v30 = vld [vmem:[%s518_s6] sm:$0xff] }
  0x20   : > { %v589_v8 = vstv %s995_s28  ;;  %702 = vmatpush.msra.mxu2 %v681_v28 }
  0x21   : > { %993 = vmatmul.msk.f32.vlgmr.msra.gmra.mxu0 %vm547_vm0, %v536_v3  ;;  %vm590_vm1 = vcmp.eq.s32.totalorder %v589_v8, 1  ;;  %v631_v16 = vstv %s1000_s30 }
  0x22   : > { %vm632_vm4 = vcmp.eq.s32.totalorder %v631_v16, 1  ;;  %703 = vmatpush.msra.mxu2 %v680_v30 }
  0x23   : > { %997 = vmatpush.xpose.msk.msra.mxu1 %vm547_vm0, %v593_v7 }
  0x26   : > { %998 = vmatmul.msk.f32.vlgmr.msra.gmra.mxu1 %vm547_vm0, %v536_v3 }
  0x29   : > { %994 = vmatmul.msk.f32.gmra.mxu0 %vm547_vm0, %v537_v6 }
  0x2e   : > { %999 = vmatmul.msk.f32.gmra.mxu1 %vm547_vm0, %v537_v6 }
  0x9e   : > { %v577_v9 = vpop.f32.mrf.mxu0 }
  0x9f   : > { %v591_v10 = vsel %vm590_vm1, %v577_v9, -3.4028235e+38 }
  0xa0   : > { %v636_v11 = vsel %vm635_vm2, %v591_v10, -inf }
  0xa1   : > { %637 = vmax.xlane.f32.xlu0 %v636_v11 }
  0xa3   : > { %v618_v19 = vpop.f32.mrf.mxu1 }
  0xa4   : > { %v624_v20 = vsel %vm543_vm3, %v618_v19, -3.4028235e+38 }
  0xa5   : > { %v633_v21 = vsel %vm632_vm4, %v624_v20, -3.4028235e+38 }
  0xa6   : > { %v580_v15 = vpop.f32.mrf.mxu0  ;;  %v642_v23 = vsel %vm635_vm2, %v633_v21, -inf }
  0xa7   : > { %v592_v17 = vsel %vm590_vm1, %v580_v15, -3.4028235e+38 }
  0xa8   : > { %v639_v18 = vsel %vm635_vm2, %v592_v17, -inf }
  0xa9   : > { %640 = vmax.xlane.f32.xlu1 %v639_v18  ;;  %643 = vmax.xlane.f32.xlu0 %v642_v23 }
  0xab   : > { %v621_v24 = vpop.f32.mrf.mxu1 }
  0xac   : > { %v625_v25 = vsel %vm544_vm5, %v621_v24, -3.4028235e+38 }
  0xad   : > { %v634_v26 = vsel %vm632_vm4, %v625_v25, -3.4028235e+38 }
  0xae   : > { %v645_v27 = vsel %vm635_vm2, %v634_v26, -inf }
  0xb1   : > { %646 = vmax.xlane.f32.xlu1 %v645_v27 }
 0x114   : > { %v638_v32 = vpop.xlane.xlu0 %637 }
 0x11c   : > { %v641_v33 = vpop.xlane.xlu1 %640  ;;  %v644_v34 = vpop.xlane.xlu0 %643 }
 0x11d   : > { %v648_v35 = vmax.f32 %v638_v32, %v644_v34 }
 0x11f   : > { %v650_v36 = vsub.f32 %v591_v10, %v648_v35  ;;  %v666_v37 = vsub.f32 %v633_v21, %v648_v35 }
 0x121   : > { %v652_v38 = vmul.f32 1.442695, %v650_v36  ;;  %v668_v39 = vmul.f32 1.442695, %v666_v37 }
 0x123   : > { %1071 = vpow2.f32 %v652_v38 }
 0x124   : > { %1073 = vpow2.f32 %v668_v39  ;;  %v647_v40 = vpop.xlane.xlu1 %646 }
 0x125   : > { %v649_v41 = vmax.f32 %v641_v33, %v647_v40 }
 0x127   : > { %v651_v42 = vsub.f32 %v592_v17, %v649_v41  ;;  %v667_v43 = vsub.f32 %v634_v26, %v649_v41 }
 0x129   : > { %v1072_v44 = vpop.eup %1071  ;;  %v654_v45 = vmul.f32 1.442695, %v651_v42  ;;  %v670_v46 = vmul.f32 1.442695, %v667_v43 }
 0x12a   : > { %v1074_v47 = vpop.eup %1073  ;;  %1003 = vmatmul.msk.f32.vlgmr.msra.gmra.mxu3 %vm635_vm2, %v1072_v44  ;;  %v656_v48 = vsel %vm635_vm2, %v1072_v44, 0.0 }
 0x12b   : > { %1075 = vpow2.f32 %v654_v45  ;;  %1001 = vmatmul.msk.f32.vlgmr.msra.gmra.mxu2 %vm635_vm2, %v1074_v47  ;;  %v672_v49 = vsel %vm635_vm2, %v1074_v47, 0.0  ;;  %657 = vadd.xlane.f32.xlu2 %v656_v48 }
 0x12c   : > { %1077 = vpow2.f32 %v670_v46  ;;  %673 = vadd.xlane.f32.xlu0 %v672_v49 }
 0x131   : > { %v1076_v50 = vpop.eup %1075 }
 0x132   : > { %v1078_v51 = vpop.eup %1077  ;;  %1004 = vmatmul.msk.f32.gmra.mxu3 %vm635_vm2, %v1076_v50  ;;  %v659_v52 = vsel %vm635_vm2, %v1076_v50, 0.0 }
 0x133   : > { %1002 = vmatmul.msk.f32.gmra.mxu2 %vm635_vm2, %v1078_v51  ;;  %v675_v53 = vsel %vm635_vm2, %v1078_v51, 0.0  ;;  %660 = vadd.xlane.f32.xlu2 %v659_v52 }
 0x134   : > { %676 = vadd.xlane.f32.xlu1 %v675_v53 }
 0x19e   : > { %v658_v54 = vpop.xlane.xlu2 %657 }
 0x19f   : > { %v674_v55 = vpop.xlane.xlu0 %673 }
 0x1a0   : > { %v678_v56 = vadd.f32 %v674_v55, %v658_v54 }
 0x1a2   : > { %1079 = vrcp.f32 %v678_v56 }
 0x1a6   : > { %v661_v58 = vpop.xlane.xlu2 %660 }
 0x1a7   : > { %v677_v57 = vpop.xlane.xlu1 %676 }
 0x1a8   : > { %v679_v60 = vadd.f32 %v677_v57, %v661_v58  ;;  %v1080_v63 = vpop.eup %1079 }
 0x1aa   : > { %1081 = vrcp.f32 %v679_v60 }
 0x1ad   : > { %v734_v59 = vpop.f32.mrf.mxu3 }
 0x1ae   : > { %v705_v61 = vpop.f32.mrf.mxu2 }
 0x1af   : > { %v735_v62 = vadd.f32 %v734_v59, %v705_v61 }
 0x1b0   : > { %v1082_v4 = vpop.eup %1081 }
 0x1b1   : > { %v742_v0 = vmul.f32 %v1080_v63, %v735_v62 }
 0x1b3   : > { %744 = vst.msk [vmem:[%s532_s13] sm:$0xff] %vm547_vm0, %v742_v0 }
 0x1b5   : > { %v737_v1 = vpop.f32.mrf.mxu3 }
 0x1b6   : > { %v708_v2 = vpop.f32.mrf.mxu2 }
 0x1b7   : > { %v738_v3 = vadd.f32 %v737_v1, %v708_v2 }
 0x1b9   : > { %v743_v5 = vmul.f32 %v1082_v4, %v738_v3 }
 0x1bb   : > { %745 = vst.msk [vmem:[%s532_s13 + $0x8] sm:$0xff] %vm547_vm0, %v743_v5 }
 0x1bc PF: > { %s15_s22 = sadd.s32 1, %s1121_s22   ;;  %s1272_s18 = smov %s1113_s20 }
 0x1bd   : > { %p12_p5 = scmp.ge.s32.totalorder %s15_s22, 34   ;;  %s1273_s19 = smov %s1117_s21 }
 0x1be   : > { %s1274_s20 = smov %s1277_s23  ;;  %s1275_s21 = smov %s1281_s24 }
 0x1bf   :  { %14 = sbr.rel (!%p12_p5) target bundleno = 3 (0x3), region = 82 }

</bundles_post_ra>
